<compile_context>
chip_gen: v7x
topology: tpu7x:2x2x1
jax: 0.10.0
libtpu: 0.0.40
codegen_flags: <defaults>
</compile_context>

<pallas_src>
import jax
import jax.numpy as jnp
from jax import lax
from jax.experimental import pallas as pl
from jax.experimental.pallas import tpu as pltpu


def _round_up(x: int, m: int) -> int:
    return ((x + m - 1) // m) * m


def _vmem_capacity_bytes() -> int:
    try:
        cap = int(getattr(pltpu.get_tpu_info(), "vmem_capacity_bytes"))
        if cap > 0:
            return cap
    except Exception:
        pass
    return 64 << 20  # conservative default (v7x has the smallest VMEM)


_ONE_HOT_MAX_N = 2048          # above this the (TM, N) one-hot gets too fat -> jnp.take
_FALLBACK_ROWS_PER_STEP = 128  # R for the HBM batched-DMA fallback


# ----------------------------------------------------------------------------
# Fast path: VMEM-resident table (loaded once), vectorized gather per step.
# ----------------------------------------------------------------------------
def _load_table_once(table_hbm, table_vmem, load_sem):
    # Scratch persists across the (sequential) grid, so one DMA at step 0 is
    # enough.  This requires dimension_semantics=("arbitrary",).
    @pl.when(pl.program_id(0) == 0)
    def _():
        cp = pltpu.make_async_copy(table_hbm, table_vmem, load_sem.at[0])
        cp.start()
        cp.wait()


def _resident_onehot_kernel(idx_ref, table_hbm, out_ref, table_vmem, load_sem):
    _load_table_once(table_hbm, table_vmem, load_sem)
    ids = idx_ref[...]                                      # (TM, 1) int32
    tm = ids.shape[0]
    n = table_vmem.shape[0]
    col = lax.broadcasted_iota(jnp.int32, (tm, n), 1)
    one_hot = (ids == col).astype(table_vmem.dtype)         # exact 0/1 weights
    gathered = jnp.dot(one_hot, table_vmem[...],
                       preferred_element_type=jnp.float32)  # MXU row gather
    out_ref[...] = gathered.astype(out_ref.dtype)


def _resident_take_kernel(idx_ref, table_hbm, out_ref, table_vmem, load_sem):
    _load_table_once(table_hbm, table_vmem, load_sem)
    ids = idx_ref[...][:, 0]                                # (TM,)
    out_ref[...] = jnp.take(table_vmem[...], ids, axis=0).astype(out_ref.dtype)


def _gather_resident(shifts, idx):
    N, D = shifts.shape
    M = idx.shape[0]
    itemsize = jnp.dtype(shifts.dtype).itemsize
    use_one_hot = (N <= _ONE_HOT_MAX_N) and jnp.issubdtype(shifts.dtype, jnp.floating)

    # TM rows per grid step: big enough to amortize ~0.35us/step overhead and
    # keep output writeback dense, capped so the output double buffer stays a
    # few MiB even for very wide D.
    max_tm_out = max(8, (8 << 20) // max(1, 2 * D * itemsize))
    TM = min(512, _round_up(M, 8), max_tm_out)
    TM = max(8, (TM // 8) * 8)

    grid = pl.cdiv(M, TM)
    M_pad = grid * TM
    if M_pad != M:
        idx = jnp.pad(idx, (0, M_pad - M))   # padded rows gather row 0, sliced off later
    idx2d = idx.reshape(M_pad, 1)

    # VMEM: 1x resident table + double-buffered (TM, D) out blocks +
    # (TM, 1)->lane-padded idx blocks + gather intermediates + margin.
    onehot_bytes = TM * N * 4 if use_one_hot else 0
    needed = (N * D * itemsize
              + 2 * TM * D * itemsize
              + 2 * TM * 128 * 4
              + onehot_bytes + TM * D * 4
              + (2 << 20))
    vmem_limit = min(max(needed, 32 << 20), _vmem_capacity_bytes())

    kernel = _resident_onehot_kernel if use_one_hot else _resident_take_kernel

    grid_spec = pltpu.PrefetchScalarGridSpec(
        num_scalar_prefetch=0,
        grid=(grid,),
        in_specs=[
            pl.BlockSpec((TM, 1), lambda i: (i, 0)),   # idx block (VMEM)
            pl.BlockSpec(memory_space=pl.ANY),         # table stays in HBM; DMA'd once
        ],
        out_specs=pl.BlockSpec((TM, D), lambda i: (i, 0)),
        scratch_shapes=[
            pltpu.VMEM((N, D), shifts.dtype),          # resident table (single copy)
            pltpu.SemaphoreType.DMA((1,)),
        ],
    )
    out = pl.pallas_call(
        kernel,
        out_shape=jax.ShapeDtypeStruct((M_pad, D), shifts.dtype),
        grid_spec=grid_spec,
        compiler_params=pltpu.CompilerParams(
            # "arbitrary": the resident-table scratch is loaded at step 0 and
            # reused by later steps; megacore sharding would leave the second
            # core's copy uninitialized.
            dimension_semantics=("arbitrary",),
            vmem_limit_bytes=vmem_limit),
    )(idx2d, shifts)
    return out[:M] if M_pad != M else out


# ----------------------------------------------------------------------------
# Fallback path: table too large for VMEM -> batched manual-DMA row gather.
# ----------------------------------------------------------------------------
def _hbm_gather_kernel(idx_ref, table_hbm, out_ref, buf, sems):
    step = pl.program_id(0)
    nsteps = pl.num_programs(0)
    R = out_ref.shape[0]

    def fetch_block(block, slot):
        base = block * R

        def body(r, carry):
            row = idx_ref[base + r]                         # scalar read from SMEM
            pltpu.make_async_copy(
                table_hbm.at[pl.ds(row, 1), :],
                buf.at[slot, pl.ds(r, 1), :],
                sems.at[slot, r],
            ).start()
            return carry

        lax.fori_loop(0, R, body, 0)

    # Prime the pipeline with block 0.
    @pl.when(step == 0)
    def _():
        fetch_block(0, 0)

    slot = lax.rem(step, 2)

    # Prefetch the next block into the other buffer while this one is consumed.
    @pl.when(step + 1 < nsteps)
    def _():
        fetch_block(step + 1, lax.rem(step + 1, 2))

    # Wait for all R row DMAs of the current block.
    def wait_body(r, carry):
        pltpu.make_async_copy(
            table_hbm.at[pl.ds(0, 1), :],
            buf.at[slot, pl.ds(r, 1), :],
            sems.at[slot, r],
        ).wait()
        return carry

    lax.fori_loop(0, R, wait_body, 0)

    out_ref[...] = buf[slot]                                # dense (R, D) store


def _gather_hbm_batched(shifts, idx):
    N, D = shifts.shape
    M = idx.shape[0]
    itemsize = jnp.dtype(shifts.dtype).itemsize

    R = min(_FALLBACK_ROWS_PER_STEP, _round_up(M, 8))
    R = max(8, (R // 8) * 8)
    grid = pl.cdiv(M, R)
    M_pad = grid * R
    if M_pad != M:
        idx = jnp.pad(idx, (0, M_pad - M))

    needed = 4 * R * D * itemsize + (4 << 20)
    vmem_limit = min(max(needed, 32 << 20), _vmem_capacity_bytes())

    grid_spec = pltpu.PrefetchScalarGridSpec(
        num_scalar_prefetch=1,                       # idx -> SMEM (DMA addressing)
        grid=(grid,),
        in_specs=[pl.BlockSpec(memory_space=pl.ANY)],  # table stays in HBM
        out_specs=pl.BlockSpec((R, D), lambda i, idx_ref: (i, 0)),
        scratch_shapes=[
            pltpu.VMEM((2, R, D), shifts.dtype),       # double-buffered staging
            pltpu.SemaphoreType.DMA((2, R)),
        ],
    )
    out = pl.pallas_call(
        _hbm_gather_kernel,
        out_shape=jax.ShapeDtypeStruct((M_pad, D), shifts.dtype),
        grid_spec=grid_spec,
        compiler_params=pltpu.CompilerParams(
            # "arbitrary": block s is prefetched at step s-1 (cross-step dep).
            # TODO(synk): per-core pipeline priming would allow "parallel"
            # (megacore) on v7x.
            dimension_semantics=("arbitrary",),
            vmem_limit_bytes=vmem_limit),
    )(idx, shifts)
    return out[:M] if M_pad != M else out


# ----------------------------------------------------------------------------
# Public entry point.
# ----------------------------------------------------------------------------
def shift_model_forward(shifts: jax.Array, idx: jax.Array) -> jax.Array:
    """Pallas equivalent of `ShiftModel.forward`: returns shifts[idx]."""
    assert shifts.ndim == 2 and idx.ndim == 1
    N, D = shifts.shape
    # Clamp untrusted indices: the data-dependent fetches have no runtime
    # bounds check.  NOTE: differs from PyTorch, which errors on OOB indices.
    idx = jnp.clip(idx.astype(jnp.int32), 0, N - 1)

    # Lane-pad wide, non-128-multiple feature dims so output stores are dense
    # full vregs instead of masked partial stores (cheap one-time pad).
    D_out = D
    if D > 128 and D % 128 != 0:
        shifts = jnp.pad(shifts, ((0, 0), (0, _round_up(D, 128) - D)))
        D = shifts.shape[1]
    # TODO(synk): for D < 128, pack several gathered rows into one lane-dense
    # output row (wrapper-side reshape) to avoid masked vst.msk stores.

    itemsize = jnp.dtype(shifts.dtype).itemsize
    table_bytes = N * D * itemsize
    # The table is held as a single VMEM copy (manual residency), so ~3/4 of
    # the chip's VMEM can be budgeted for it: ~48 MiB on v7x, ~96 MiB on v5e/v6e.
    resident_budget = (_vmem_capacity_bytes() * 3) // 4

    if table_bytes <= resident_budget:
        out = _gather_resident(shifts, idx)
    else:
        out = _gather_hbm_batched(shifts, idx)
    return out[:, :D_out] if D_out != D else out


if __name__ == "__main__":
    key = jax.random.PRNGKey(0)
    k_shifts, k_idx = jax.random.split(key)

    # Small shapes consistent with the module: shifts is an (N, D) parameter
    # table, idx a 1-D integer index (M not a multiple of 8 to exercise the
    # padded-output path).
    N, D, M = 64, 128, 20
    shifts = jax.random.normal(k_shifts, (N, D), dtype=jnp.float32)
    idx = jax.random.randint(k_idx, (M,), 0, N, dtype=jnp.int32)

    out = shift_model_forward(shifts, idx)
    out = jax.block_until_ready(out)

    # Correctness check against plain-JAX reference (silent on success).
    ref = shifts[idx]
    assert out.shape == (M, D) and out.dtype == shifts.dtype
    assert bool(jnp.allclose(out, ref)), "Pallas gather mismatch"

    print("KERNEL_OK")
</pallas_src>

<mosaic_0001>
module attributes {stable_mosaic.version = 11 : i64} {
  func.func @_resident_onehot_kernel(%arg0: i32, %arg1: memref<24x1xi32, #tpu.memory_space<vmem>>, %arg2: memref<64x128xf32, #tpu.memory_space<any>>, %arg3: memref<24x128xf32, #tpu.memory_space<vmem>>, %arg4: memref<64x128xf32, #tpu.memory_space<vmem>>, %arg5: memref<1x!tpu.dma_semaphore, #tpu.memory_space<semaphore_mem>>) attributes {dimension_semantics = [#tpu.dimension_semantics<arbitrary>], iteration_bounds = array<i64: 1>, scalar_prefetch = 0 : i64, scratch_operands = 2 : i64, tpu.core_type = #tpu.core_type<tc>, window_params = [{transform_indices = @transform_0, window_bounds = array<i64: 24, 1>}, {}, {transform_indices = @transform_2, window_bounds = array<i64: 24, 128>}]} {
    %c0_i32 = arith.constant 0 : i32
    %0 = arith.cmpi eq, %arg0, %c0_i32 : i32
    %1 = arith.extui %0 : i1 to i32
    %c0_i32_0 = arith.constant 0 : i32
    %2 = arith.cmpi ne, %1, %c0_i32_0 : i32
    scf.if %2 {
      %c0_i32_6 = arith.constant 0 : i32
      %12 = tpu.memref_slice %arg5[%c0_i32_6] : memref<1x!tpu.dma_semaphore, #tpu.memory_space<semaphore_mem>> -> memref<1x!tpu.dma_semaphore, #tpu.memory_space<semaphore_mem>>
      %13 = tpu.memref_squeeze %12 : memref<1x!tpu.dma_semaphore, #tpu.memory_space<semaphore_mem>> -> memref<!tpu.dma_semaphore, #tpu.memory_space<semaphore_mem>>
      tpu.enqueue_dma source(%arg2 : memref<64x128xf32, #tpu.memory_space<any>>) target(%arg4 : memref<64x128xf32, #tpu.memory_space<vmem>>) target_semaphore(%13 : memref<!tpu.dma_semaphore, #tpu.memory_space<semaphore_mem>>)
      %c0_i32_7 = arith.constant 0 : i32
      %14 = tpu.memref_slice %arg5[%c0_i32_7] : memref<1x!tpu.dma_semaphore, #tpu.memory_space<semaphore_mem>> -> memref<1x!tpu.dma_semaphore, #tpu.memory_space<semaphore_mem>>
      %15 = tpu.memref_squeeze %14 : memref<1x!tpu.dma_semaphore, #tpu.memory_space<semaphore_mem>> -> memref<!tpu.dma_semaphore, #tpu.memory_space<semaphore_mem>>
      tpu.wait_dma2 semaphore(%15 : memref<!tpu.dma_semaphore, #tpu.memory_space<semaphore_mem>>) src(%arg2 : memref<64x128xf32, #tpu.memory_space<any>>) dst(%arg4 : memref<64x128xf32, #tpu.memory_space<vmem>>)
    } else {
    }
    %c0 = arith.constant 0 : index
    %c0_1 = arith.constant 0 : index
    %3 = vector.load %arg1[%c0, %c0_1] : memref<24x1xi32, #tpu.memory_space<vmem>>, vector<24x1xi32>
    %4 = tpu.iota {dimensions = array<i32: 1>} : vector<24x64xi32>
    %5 = vector.broadcast %3 : vector<24x1xi32> to vector<24x64xi32>
    %6 = arith.cmpi eq, %5, %4 : vector<24x64xi32>
    %7 = arith.extui %6 : vector<24x64xi1> to vector<24x64xi32>
    %8 = arith.sitofp %7 : vector<24x64xi32> to vector<24x64xf32>
    %c0_2 = arith.constant 0 : index
    %c0_3 = arith.constant 0 : index
    %9 = vector.load %arg4[%c0_2, %c0_3] : memref<64x128xf32, #tpu.memory_space<vmem>>, vector<64x128xf32>
    %cst = arith.constant dense<0.000000e+00> : vector<24x128xf32>
    %10 = tpu.matmul %8, %9, %cst {dimension_numbers = #tpu.dot_dimension_numbers<[1], [0], [0], [1], [0, 0, 1, 1], [], []>} : vector<24x64xf32>, vector<64x128xf32>, vector<24x128xf32> -> vector<24x128xf32>
    %c0_4 = arith.constant 0 : index
    %c0_5 = arith.constant 0 : index
    %11 = vector.load %arg3[%c0_4, %c0_5] : memref<24x128xf32, #tpu.memory_space<vmem>>, vector<24x128xf32>
    tpu.vector_store %arg3[%c0_4, %c0_5], %10 {strides = array<i32>} : memref<24x128xf32, #tpu.memory_space<vmem>>, vector<24x128xf32>,
    return
  }
  func.func @transform_0(%arg0: i32) -> (i32, i32) {
    %c0_i32 = arith.constant 0 : i32
    %c0_i32_0 = arith.constant 0 : i32
    return %arg0, %c0_i32 : i32, i32
  }
  func.func @transform_2(%arg0: i32) -> (i32, i32) {
    %c0_i32 = arith.constant 0 : i32
    %c0_i32_0 = arith.constant 0 : i32
    return %arg0, %c0_i32 : i32, i32
  }
}

</mosaic_0001>

<bundles_post_ra>
// kernel: tpu_custom_call.1
= control target key start
LH: loop header
LB: loop body
LE: loop exit
PB: predicated region body
PF: predicated region fallthrough
CT: control target
= control target key end

     0   :  { %7 = vsyncpa [#allocation5], 0  ;;  %s295_s9 = smov [#allocation2]   ;;  %s354_s0 = inlined_call_operand.vmem [shape: s32[24,1], index: 0, kind: input, shape index: {}]   ;;  %s355_s1 = inlined_call_operand.hbm [shape: f32[64,128], index: 1, kind: input, shape index: {}]   ;;  %s356_s2 = inlined_call_operand.hbm [shape: f32[24,128], index: 2, kind: output, shape index: {}]  }
   0x1   :  { %s21_s10 = sshll.u32 %s295_s9, 4  ;;  %s247_s13 = scalar_lea.hbm %s355_s1, 1024  ;;  %s22_s10 = int_to_ptr.vmem [resolvable:$true] %s21_s10 }
   0x2   :  { %p248_p0 = scmp.ne.s32.totalorder %s355_s1, %s247_s13  ;;  %p251_p1 = scmp.lt.u32.totalorder %s247_s13, %s355_s1 }
   0x4   :  { %p253_p2 = pnand %p251_p1, %p248_p0 }
   0x6   :  { %256 = shalt.err (!%p253_p2)  }
   0x7   :  { %s257_s18 = scalar_lea.vmem %s22_s10, 1024  ;;  %p262_p4 = scmp.lt.s32.totalorder %s22_s10, %s22_s10 }
   0x8   :  { %p258_p3 = scmp.ne.s32.totalorder %s22_s10, %s257_s18  ;;  %p263_p5 = scmp.lt.s32.totalorder %s257_s18, %s257_s18 }
   0xa   :  { %p264_p6 = por %p263_p5, %p262_p4 }
   0xc   :  { %p265_p7 = pnand %p264_p6, %p258_p3 }
   0xe   :  { %268 = shalt.err (!%p265_p7)  }
   0xf   :  { %24 = dma.hbm_to_vmem [thread:$0]  %s355_s1, 1024, %s22_s10, [#allocation3] }
  0x10   :  { %291 = dma.done.wait [#allocation3], 1024 }
  0x11   :  { %292 = vsyncadd [#allocation3], 4294966272  ;;  %v296_v0 = vmov 0   ;;  %v297_v1 = vmov 0.0|0.0   ;;  %v29_v2 = vld [vmem:[%s354_s0 + $0x8] sm:$0xff]  ;;  %v30_v3 = vld [vmem:[%s354_s0 + $0x10] sm:$0xff]  ;;  %v31_v18 = vlaneseq }
  0x12   :  { %245 = vset.pattern.permute.xlu0 %v296_v0  ;;  %246 = vset.pattern.permute.xlu1 %v296_v0  ;;  %v51_v4 = vld [vmem:[#allocation2] sm:$0xff]  ;;  %v52_v5 = vld [vmem:[#allocation2 + $0x8] sm:$0xff]  ;;  %v53_v6 = vld [vmem:[#allocation2 + $0x10] sm:$0xff]  ;;  %vm298_vm0 = vmmov 0   ;;  %v299_v10 = vmov 0.0   ;;  %vm59_vm1 = vcmask 523264  }
  0x13   :  { %229 = vmatprep.subr.bf16.mxu1 %v297_v1  ;;  %217 = vmatprep.subr.bf16.mxu0 %v297_v1  ;;  %v28_v7 = vld [vmem:[%s354_s0] sm:$0xff]  ;;  %v218_v8 = vpack.c.bf16 %v52_v5, %v51_v4  ;;  %v54_v9 = vld [vmem:[#allocation2 + $0x18] sm:$0xff]  ;;  %v56_v13 = vld [vmem:[#allocation2 + $0x28] sm:$0xff]  ;;  %v32_v19 = vand.u32 127, %v31_v18  ;;  %s300_s0 = smov [#allocation4]  }
  0x14   :  { %37 = vperm.xlu0 %245, %v29_v2   ;;  %40 = vperm.xlu1 %246, %v30_v3   ;;  %v221_v11 = vpack.c.bf16 %v54_v9, %v53_v6  ;;  %v55_v12 = vld [vmem:[#allocation2 + $0x20] sm:$0xff]  ;;  %v57_v15 = vld [vmem:[#allocation2 + $0x30] sm:$0xff]  ;;  %v58_v16 = vld [vmem:[#allocation2 + $0x38] sm:$0xff]  ;;  %s157_s26 = sshll.u32 %s300_s0, 4  ;;  %s158_s26 = int_to_ptr.vmem [resolvable:$true] %s157_s26 }
  0x15   :  { %211 = vmatprep.mubr.msk.f32.mxu1 %vm298_vm0, %v299_v10  ;;  %208 = vmatprep.mubr.msk.f32.mxu0 %vm298_vm0, %v299_v10  ;;  %v224_v14 = vpack.c.bf16 %v56_v13, %v55_v12  ;;  %v227_v17 = vpack.c.bf16 %v58_v16, %v57_v15  ;;  %s269_s27 = scalar_lea.vmem %s158_s26, 384  ;;  %p274_p9 = scmp.lt.s32.totalorder %s158_s26, %s158_s26 }
  0x16   :  { %233 = vmatpush3.bf16.msra.mxu1 %v218_v8  ;;  %219 = vmatpush3.bf16.msra.mxu0 %v218_v8  ;;  %p270_p8 = scmp.ne.s32.totalorder %s158_s26, %s269_s27  ;;  %p275_p10 = scmp.lt.s32.totalorder %s269_s27, %s269_s27 }
  0x17   :  { %230 = vmatprep.subr.bf16.mxu1 %v297_v1  ;;  %220 = vmatprep.subr.bf16.mxu0 %v297_v1 }
  0x18   :  { %34 = vperm.xlu0 %245, %v28_v7   ;;  %p276_p11 = por %p275_p10, %p274_p9 }
  0x1a   :  { %234 = vmatpush3.bf16.msra.mxu1 %v221_v11  ;;  %222 = vmatpush3.bf16.msra.mxu0 %v221_v11  ;;  %p277_p12 = pnand %p276_p11, %p270_p8 }
  0x1b   :  { %231 = vmatprep.subr.bf16.mxu1 %v297_v1  ;;  %223 = vmatprep.subr.bf16.mxu0 %v297_v1 }
  0x1e   :  { %235 = vmatpush3.bf16.msra.mxu1 %v224_v14  ;;  %225 = vmatpush3.bf16.msra.mxu0 %v224_v14 }
  0x1f   :  { %232 = vmatprep.subr.bf16.mxu1 %v297_v1  ;;  %226 = vmatprep.subr.bf16.mxu0 %v297_v1 }
  0x22   :  { %236 = vmatpush3.bf16.msra.mxu1 %v227_v17  ;;  %228 = vmatpush3.bf16.msra.mxu0 %v227_v17 }
  0x93   :  { %v38_v20 = vpop.permute.xlu0 %37  ;;  %v41_v21 = vpop.permute.xlu1 %40 }
  0x94   :  { %vm43_vm2 = vcmp.eq.s32.totalorder %v38_v20, %v32_v19  ;;  %vm44_vm3 = vcmp.eq.s32.totalorder %v41_v21, %v32_v19 }
  0x95   :  { %v175_v22 = vsel %vm43_vm2, 1.0, %v299_v10  ;;  %v176_v23 = vsel %vm44_vm3, 1.0, %v299_v10 }
  0x96   :  { %212 = vmatmul.mubr.msk.f32.vlgmr.msra.gmra.mrb[0].mxu1 %vm59_vm1, %v175_v22 }
  0x97   :  { %v35_v24 = vpop.permute.xlu0 %34  ;;  %214 = vmatprep.mubr.msk.f32.mxu1 %vm298_vm0, %v299_v10 }
  0x98   :  { %vm42_vm4 = vcmp.eq.s32.totalorder %v35_v24, %v32_v19 }
  0x99   :  { %v174_v25 = vsel %vm42_vm4, 1.0, %v299_v10 }
  0x9a   :  { %209 = vmatmul.mubr.msk.f32.vlgmr.msra.gmra.mrb[0].mxu0 %vm59_vm1, %v174_v25  ;;  %215 = vmatmul.mubr.msk.f32.gmra.mrb[2].mxu1 %vm59_vm1, %v176_v23 }
 0x169   :  { %v140_v26 = vpop.f32.mrb[0].mxu1 }
 0x16a   :  { %150 = vst [vmem:[#allocation4 + $0x8] sm:$0xff] %v140_v26  ;;  %v213_v27 = vpop.f32.mrb[1].mxu1 }
 0x16d   :  { %v135_v28 = vpop.f32.mrb[0].mxu0  ;;  %v145_v29 = vpop.f32.mrb[2].mxu1 }
 0x16e   :  { %149 = vst [vmem:[#allocation4] sm:$0xff] %v135_v28  ;;  %151 = vst [vmem:[#allocation4 + $0x10] sm:$0xff] %v145_v29  ;;  %v210_v30 = vpop.f32.mrb[1].mxu0  ;;  %v216_v31 = vpop.f32.mrb[3].mxu1 }
 0x16f   :  { %280 = shalt.err (!%p277_p12)
}
 0x170   :  { %s281_s30 = scalar_lea.hbm %s356_s2, 384 }
 0x171   :  { %p282_p13 = scmp.ne.s32.totalorder %s356_s2, %s281_s30  ;;  %p285_p0 = scmp.lt.u32.totalorder %s281_s30, %s356_s2 }
 0x173   :  { %p287_p1 = pnand %p285_p0, %p282_p13 }
 0x175   :  { %290 = shalt.err (!%p287_p1)
}
 0x176   :  { %s301_s7 = smov 128   ;;  %s302_s8 = smov 8  }
 0x177   :  { %163 = dma.vmem_to_hbm [thread:$0]  %s158_s26, 384, %s356_s2, [#allocation5], %s301_s7, %s301_s7, %s302_s8  }
 0x178   :  { %293 = dma.done.wait [#allocation5], 384  }
 0x179   :  { %294 = vsyncadd [#allocation5], 4294966912 }
 0x17a   :  { %167 = vsyncpa [#allocation5], 1 }
 0x17b   :  { %168 = vsyncmov [#allocation3] }
 0x17e   :  { %s169_s11 = vpop.sfrf %168 }
 0x17f   :  { %p180_p2 = scmp.ne.s32.totalorder %s169_s11, 0 }
 0x181   :  { %173 = shalt.err (%p180_p2)  }

</bundles_post_ra>
